<compile_context>
chip_gen: v6e
topology: v6e:2x2x1
jax: 0.10.0
libtpu: 0.0.40
codegen_flags: <defaults>
</compile_context>

<pallas_src>
import numpy as np
import jax
import jax.numpy as jnp
from jax.experimental import pallas as pl
from jax.experimental.pallas import tpu as pltpu  # noqa: F401  (kept for TPU-targeted builds)

# ---- problem sizes (small, consistent with an FCN forward) ----
N, CIN, H, W = 2, 4, 16, 16       # input x: (N, CIN, H, W) NCHW
C1 = 8                            # backbone hidden channels
NC = 6                            # number of classes
KH = KW = 3
STRIDE = 2
HO, WO = H // STRIDE, W // STRIDE  # conv(k=3, s=2, p=1): 8 x 8
KIN = KH * KW * CIN               # 36 im2col rows
KIN_A = KIN + 1                   # 37: + ones row (bias carrier)
C1_A = C1 + 1                     # 9:  + constant-1 carrier channel


def fcn_kernel(cols_ref, w1_ref, wc_ref, kup_ref, out_ref):
    """Single invocation; batch statically unrolled (N=2).

    cols_ref: (N, 37, 64)   im2col^T per batch, last row = ones
    w1_ref:   (9, 37)       [conv weights | b1] + constant-1 carrier row
    wc_ref:   (6, 9)        [1x1 conv weights | bc]
    kup_ref:  (64, 256)     kron(R, C)^T  (bilinear upsample, align_corners=False)
    out_ref:  (N, 6, 256)   logits^T upsampled; lane-dense (256-wide) stores
    """
    w1 = w1_ref[...]
    wc = wc_ref[...]
    kup = kup_ref[...]
    for n in range(N):  # N=2: cheap static unroll, no grid-step overhead
        # backbone: 3x3 stride-2 conv as matmul (bias folded), then ReLU.
        # carrier row stays exactly 1 after ReLU and feeds bc through wc.
        feat = jnp.maximum(
            jnp.dot(w1, cols_ref[n], preferred_element_type=jnp.float32), 0.0)   # (9, 64)
        # classifier: 1x1 conv == channel matmul (bias folded via carrier row)
        logits = jnp.dot(wc, feat, preferred_element_type=jnp.float32)            # (6, 64)
        # bilinear upsample as one lane-dense matmul (256-wide MXU result)
        out_ref[n] = jnp.dot(logits, kup, preferred_element_type=jnp.float32)     # (6, 256)


def _bilinear_matrix(out_size, in_size):
    """Row-interpolation matrix matching PyTorch bilinear, align_corners=False."""
    scale = in_size / out_size
    m = np.zeros((out_size, in_size), np.float32)
    for i in range(out_size):
        src = max((i + 0.5) * scale - 0.5, 0.0)
        i0 = min(int(np.floor(src)), in_size - 1)
        i1 = min(i0 + 1, in_size - 1)
        lam = src - i0
        m[i, i0] += 1.0 - lam
        m[i, i1] += lam
    return m


def fcn_forward(x, w1, b1, wc, bc, kup_t):
    """x: (N, CIN, H, W) f32 NCHW -> (N, NC, H, W) f32 NCHW."""
    # --- glue: im2col^T directly in NCHW (pure slicing, zero FLOPs) ---
    xp = jnp.pad(x, ((0, 0), (0, 0), (1, 1), (1, 1)))
    taps = [xp[:, :, di:di + STRIDE * HO:STRIDE, dj:dj + STRIDE * WO:STRIDE]
            for di in range(KH) for dj in range(KW)]            # each (N, CIN, HO, WO)
    cols = jnp.stack(taps, axis=1).reshape(N, KIN, HO * WO)     # (N, 36, 64)
    cols = jnp.concatenate(
        [cols, jnp.ones((N, 1, HO * WO), jnp.float32)], axis=1)  # (N, 37, 64) ones row

    # --- glue: pack parameters, folding biases into the matmuls ---
    w1_t = jnp.transpose(w1, (0, 2, 3, 1)).reshape(C1, KIN)      # OIHW -> (C1, 9*CIN)
    w1_aug = jnp.concatenate([w1_t, b1.reshape(C1, 1)], axis=1)  # (8, 37): bias column
    carrier = jnp.zeros((1, KIN_A), jnp.float32).at[0, KIN].set(1.0)
    w1_aug = jnp.concatenate([w1_aug, carrier], axis=0)          # (9, 37): const-1 channel
    wc_aug = jnp.concatenate([wc, bc.reshape(NC, 1)], axis=1)    # (6, 9): bc column

    out_flat = pl.pallas_call(
        fcn_kernel,
        out_shape=jax.ShapeDtypeStruct((N, NC, H * W), jnp.float32),
        # no grid: one invocation, whole (tiny) arrays resident in VMEM
    )(cols, w1_aug, wc_aug, kup_t)

    # channels-major already: reshape straight to NCHW, no transpose needed
    return out_flat.reshape(N, NC, H, W)


if __name__ == "__main__":
    key = jax.random.PRNGKey(0)
    kx, kw1, kb1, kwc, kbc = jax.random.split(key, 5)

    # deterministic synthetic parameters (PyTorch conv weight layouts)
    x = jax.random.normal(kx, (N, CIN, H, W), jnp.float32)
    w1 = 0.1 * jax.random.normal(kw1, (C1, CIN, KH, KW), jnp.float32)   # Conv2d(CIN, C1, 3)
    b1 = 0.1 * jax.random.normal(kb1, (C1,), jnp.float32)
    wc = 0.1 * jax.random.normal(kwc, (NC, C1), jnp.float32)            # Conv2d(C1, NC, 1)
    bc = 0.1 * jax.random.normal(kbc, (NC,), jnp.float32)

    # bilinear upsample (align_corners=False) fused as kron(R, C), passed transposed
    R = _bilinear_matrix(H, HO)
    C = _bilinear_matrix(W, WO)
    kup_t = jnp.asarray(np.kron(R, C).T)                # (HO*WO, H*W) = (64, 256)

    out = jax.block_until_ready(fcn_forward(x, w1, b1, wc, bc, kup_t))
    assert out.shape == (N, NC, H, W) and out.dtype == jnp.float32

    # pure-JAX reference for correctness
    ref_feat = jax.lax.conv_general_dilated(
        x, w1, window_strides=(STRIDE, STRIDE), padding=((1, 1), (1, 1)),
        dimension_numbers=("NCHW", "OIHW", "NCHW")) + b1.reshape(1, C1, 1, 1)
    ref_feat = jnp.maximum(ref_feat, 0.0)
    ref_logits = jnp.einsum("nchw,oc->nohw", ref_feat, wc) + bc.reshape(1, NC, 1, 1)
    ref_out = jnp.einsum("Hh,nohw,Ww->noHW",
                         jnp.asarray(R), ref_logits, jnp.asarray(C))
    np.testing.assert_allclose(np.asarray(out), np.asarray(ref_out),
                               rtol=1e-4, atol=1e-4)

    print("KERNEL_OK")
</pallas_src>

<mosaic_0001>
module attributes {stable_mosaic.version = 11 : i64} {
  func.func @fcn_kernel(%arg0: memref<2x37x64xf32, #tpu.memory_space<vmem>>, %arg1: memref<9x37xf32, #tpu.memory_space<vmem>>, %arg2: memref<6x9xf32, #tpu.memory_space<vmem>>, %arg3: memref<64x256xf32, #tpu.memory_space<vmem>>, %arg4: memref<2x6x256xf32, #tpu.memory_space<vmem>>) attributes {dimension_semantics = [], scalar_prefetch = 0 : i64, scratch_operands = 0 : i64, tpu.core_type = #tpu.core_type<tc>} {
    %c0 = arith.constant 0 : index
    %c0_0 = arith.constant 0 : index
    %0 = vector.load %arg1[%c0, %c0_0] : memref<9x37xf32, #tpu.memory_space<vmem>>, vector<9x37xf32>
    %c0_1 = arith.constant 0 : index
    %c0_2 = arith.constant 0 : index
    %1 = vector.load %arg2[%c0_1, %c0_2] : memref<6x9xf32, #tpu.memory_space<vmem>>, vector<6x9xf32>
    %c0_3 = arith.constant 0 : index
    %c0_4 = arith.constant 0 : index
    %2 = vector.load %arg3[%c0_3, %c0_4] : memref<64x256xf32, #tpu.memory_space<vmem>>, vector<64x256xf32>
    %c0_5 = arith.constant 0 : index
    %c0_6 = arith.constant 0 : index
    %c0_7 = arith.constant 0 : index
    %3 = vector.load %arg0[%c0_5, %c0_6, %c0_7] : memref<2x37x64xf32, #tpu.memory_space<vmem>>, vector<1x37x64xf32>
    %4 = vector.shape_cast %3 : vector<1x37x64xf32> to vector<37x64xf32>
    %cst = arith.constant dense<0.000000e+00> : vector<9x64xf32>
    %5 = tpu.matmul %0, %4, %cst {dimension_numbers = #tpu.dot_dimension_numbers<[1], [0], [0], [1], [0, 0, 1, 1], [], []>} : vector<9x37xf32>, vector<37x64xf32>, vector<9x64xf32> -> vector<9x64xf32>
    %cst_8 = arith.constant 0.000000e+00 : f32
    %6 = vector.broadcast %cst_8 : f32 to vector<9x64xf32>
    %7 = arith.maximumf %5, %6 : vector<9x64xf32>
    %cst_9 = arith.constant dense<0.000000e+00> : vector<6x64xf32>
    %8 = tpu.matmul %1, %7, %cst_9 {dimension_numbers = #tpu.dot_dimension_numbers<[1], [0], [0], [1], [0, 0, 1, 1], [], []>} : vector<6x9xf32>, vector<9x64xf32>, vector<6x64xf32> -> vector<6x64xf32>
    %cst_10 = arith.constant dense<0.000000e+00> : vector<6x256xf32>
    %9 = tpu.matmul %8, %2, %cst_10 {dimension_numbers = #tpu.dot_dimension_numbers<[1], [0], [0], [1], [0, 0, 1, 1], [], []>} : vector<6x64xf32>, vector<64x256xf32>, vector<6x256xf32> -> vector<6x256xf32>
    %c0_11 = arith.constant 0 : index
    %c0_12 = arith.constant 0 : index
    %c0_13 = arith.constant 0 : index
    %10 = vector.load %arg4[%c0_11, %c0_12, %c0_13] : memref<2x6x256xf32, #tpu.memory_space<vmem>>, vector<1x6x256xf32>
    %11 = vector.shape_cast %10 : vector<1x6x256xf32> to vector<6x256xf32>
    %12 = vector.shape_cast %9 : vector<6x256xf32> to vector<1x6x256xf32>
    tpu.vector_store %arg4[%c0_11, %c0_12, %c0_13], %12 {strides = array<i32>} : memref<2x6x256xf32, #tpu.memory_space<vmem>>, vector<1x6x256xf32>,
    %c1 = arith.constant 1 : index
    %c0_14 = arith.constant 0 : index
    %c0_15 = arith.constant 0 : index
    %13 = vector.load %arg0[%c1, %c0_14, %c0_15] : memref<2x37x64xf32, #tpu.memory_space<vmem>>, vector<1x37x64xf32>
    %14 = vector.shape_cast %13 : vector<1x37x64xf32> to vector<37x64xf32>
    %cst_16 = arith.constant dense<0.000000e+00> : vector<9x64xf32>
    %15 = tpu.matmul %0, %14, %cst_16 {dimension_numbers = #tpu.dot_dimension_numbers<[1], [0], [0], [1], [0, 0, 1, 1], [], []>} : vector<9x37xf32>, vector<37x64xf32>, vector<9x64xf32> -> vector<9x64xf32>
    %cst_17 = arith.constant 0.000000e+00 : f32
    %16 = vector.broadcast %cst_17 : f32 to vector<9x64xf32>
    %17 = arith.maximumf %15, %16 : vector<9x64xf32>
    %cst_18 = arith.constant dense<0.000000e+00> : vector<6x64xf32>
    %18 = tpu.matmul %1, %17, %cst_18 {dimension_numbers = #tpu.dot_dimension_numbers<[1], [0], [0], [1], [0, 0, 1, 1], [], []>} : vector<6x9xf32>, vector<9x64xf32>, vector<6x64xf32> -> vector<6x64xf32>
    %cst_19 = arith.constant dense<0.000000e+00> : vector<6x256xf32>
    %19 = tpu.matmul %18, %2, %cst_19 {dimension_numbers = #tpu.dot_dimension_numbers<[1], [0], [0], [1], [0, 0, 1, 1], [], []>} : vector<6x64xf32>, vector<64x256xf32>, vector<6x256xf32> -> vector<6x256xf32>
    %c1_20 = arith.constant 1 : index
    %c0_21 = arith.constant 0 : index
    %c0_22 = arith.constant 0 : index
    %20 = vector.load %arg4[%c1_20, %c0_21, %c0_22] : memref<2x6x256xf32, #tpu.memory_space<vmem>>, vector<1x6x256xf32>
    %21 = vector.shape_cast %20 : vector<1x6x256xf32> to vector<6x256xf32>
    %22 = vector.shape_cast %19 : vector<6x256xf32> to vector<1x6x256xf32>
    tpu.vector_store %arg4[%c1_20, %c0_21, %c0_22], %22 {strides = array<i32>} : memref<2x6x256xf32, #tpu.memory_space<vmem>>, vector<1x6x256xf32>,
    return
  }
}

</mosaic_0001>

<bundles_post_ra>
// kernel: tpu_custom_call.1
= control target key start
LH: loop header
LB: loop body
LE: loop exit
PB: predicated region body
PF: predicated region fallthrough
CT: control target
= control target key end

     0   :  { %vm48_vm0 = vcmask 1044480   ;;  %vm41_vm1 = vcmask 302080   ;;  %v605_v7 = vmov 0.0   ;;  %vm606_vm2 = vmmov 0   ;;  %s791_s0 = inlined_call_operand.vmem [shape: f32[2,37,64], index: 0, kind: input, shape index: {}]   ;;  %s792_s1 = inlined_call_operand.vmem [shape: f32[9,37], index: 1, kind: input, shape index: {}]   ;;  %s793_s3 = inlined_call_operand.vmem [shape: f32[64,256], index: 3, kind: input, shape index: {}]   ;;  %s794_s2 = inlined_call_operand.vmem [shape: f32[6,9], index: 2, kind: input, shape index: {}]   ;;  %s795_s4 = inlined_call_operand.vmem [shape: f32[2,6,256], index: 4, kind: output, shape index: {}]  }
   0x1   :  { %v40_v0 = vld [vmem:[%s791_s0 + $0x20] sm:$0x1f]  ;;  %v39_v1 = vld [vmem:[%s791_s0 + $0x18] sm:$0xff]  ;;  %v38_v3 = vld [vmem:[%s791_s0 + $0x10] sm:$0xff]  ;;  %275 = vmatprep.mubr.f32.mxu1 %v605_v7  ;;  %vm133_vm3 = vcmask 1040384   ;;  %vm129_vm4 = vcmask 72704  }
   0x2   :  { %563 = vmatprep.subr.msk.mxu0 %vm48_vm0, %v40_v0  ;;  %v642_v2 = vld [vmem:[%s792_s1] sm:$0xff]  ;;  %v37_v4 = vld [vmem:[%s791_s0 + $0x8] sm:$0xff]  ;;  %v35_v8 = vld [vmem:[%s793_s3 + $0x78] sm:$0xff]  ;;  %vm207_vm5 = vcmask 523264  }
   0x3   :  { %564 = vmatpush3.msk.msra.mxu0 %vm48_vm0, %v40_v0  ;;  %573 = vmatprep.mubr.msk.f32.mxu0 %vm41_vm1, %v642_v2  ;;  %v36_v5 = vld [vmem:[%s791_s0] sm:$0xff]  ;;  %v659_v6 = vld [vmem:[%s792_s1 + $0x8] sm:$0x1]  ;;  %v673_v9 = vld [vmem:[%s793_s3 + $0x70] sm:$0xff] }
   0x4   :  { %565 = vmatprep.subr.mxu0 %v39_v1  ;;  %v678_v10 = vld [vmem:[%s793_s3 + $0x68] sm:$0xff]  ;;  %227 = vmatprep.subr.mxu1 %v35_v8  ;;  %v683_v11 = vld [vmem:[%s793_s3 + $0x60] sm:$0xff]  ;;  %v689_v12 = vld [vmem:[%s793_s3 + $0x58] sm:$0xff] }
   0x5   :  { %566 = vmatpush3.msra.mxu0 %v39_v1  ;;  %228 = vmatpush1.msra.mxu1 %v673_v9  ;;  %v695_v13 = vld [vmem:[%s793_s3 + $0x50] sm:$0xff]  ;;  %v701_v14 = vld [vmem:[%s793_s3 + $0x48] sm:$0xff]  ;;  %v28_v15 = vld [vmem:[%s793_s3 + $0x40] sm:$0xff] }
   0x6   :  { %567 = vmatprep.subr.mxu0 %v38_v3  ;;  %229 = vmatprep.subr.mxu1 %v678_v10  ;;  %v27_v16 = vld [vmem:[%s793_s3 + $0x38] sm:$0xff]  ;;  %v26_v17 = vld [vmem:[%s793_s3 + $0x30] sm:$0xff]  ;;  %v25_v18 = vld [vmem:[%s793_s3 + $0x28] sm:$0xff] }
   0x7   :  { %568 = vmatpush3.msra.mxu0 %v38_v3  ;;  %230 = vmatpush1.msra.mxu1 %v683_v11  ;;  %v24_v19 = vld [vmem:[%s793_s3 + $0x20] sm:$0xff]  ;;  %v724_v20 = vld [vmem:[%s793_s3 + $0x18] sm:$0xff]  ;;  %v22_v21 = vld [vmem:[%s793_s3 + $0x10] sm:$0xff] }
   0x8   :  { %569 = vmatprep.subr.mxu0 %v37_v4  ;;  %231 = vmatprep.subr.mxu1 %v689_v12  ;;  %v21_v22 = vld [vmem:[%s793_s3 + $0x8] sm:$0xff]  ;;  %v19_v27 = vld [vmem:[%s794_s2] sm:$0x3f]  ;;  %v532_v30 = vld [vmem:[%s791_s0 + $0x38] sm:$0xff] }
   0x9   :  { %570 = vmatpush3.msra.mxu0 %v37_v4  ;;  %232 = vmatpush1.msra.mxu1 %v695_v13  ;;  %v534_v28 = vld [vmem:[%s791_s0 + $0x48] sm:$0x1f]  ;;  %v533_v29 = vld [vmem:[%s791_s0 + $0x40] sm:$0xff]  ;;  %v531_v31 = vld [vmem:[%s791_s0 + $0x30] sm:$0xff] }
   0xa   :  { %571 = vmatprep.subr.mxu0 %v36_v5  ;;  %233 = vmatprep.subr.mxu1 %v701_v14  ;;  %v530_v32 = vld [vmem:[%s791_s0 + $0x28] sm:$0xff]  ;;  %v20_v33 = vld [vmem:[%s793_s3] sm:$0xff] }
   0xb   :  { %572 = vmatpush3.msra.mxu0 %v36_v5  ;;  %234 = vmatpush1.msra.mxu1 %v28_v15 }
   0xc   :  { %574 = vmatmul.mubr.msk.f32.vlgmr.msra.gmra.mxu0 %vm41_vm1, %v659_v6  ;;  %576 = vmatprep.subr.mxu0 %v605_v7 }
   0xd   :  { %580 = vmatprep.mubr.msk.f32.mxu0 %vm606_vm2, %v605_v7  ;;  %235 = vmatprep.subr.mxu1 %v27_v16 }
   0xe   :  { %236 = vmatpush1.msra.mxu1 %v26_v17 }
   0xf   :  { %237 = vmatprep.subr.mxu1 %v25_v18 }
  0x10   :  { %238 = vmatpush1.msra.mxu1 %v24_v19 }
  0x11   :  { %239 = vmatprep.subr.mxu1 %v724_v20 }
  0x12   :  { %240 = vmatpush1.msra.mxu1 %v22_v21 }
  0x13   :  { %241 = vmatprep.subr.mxu1 %v21_v22 }
  0x14   :  { %242 = vmatpush1.msra.mxu1 %v20_v33 }
  0x15   :  { %462 = vmatprep.subr.mxu1 %v35_v8 }
  0xcc   :  { %v575_v23 = vpop.f32.mrf.mxu0 }
  0xcd   :  { %v128_v24 = vmax.f32 %v575_v23, 0.0 }
  0xce   :  { %v118_v25 = vpop.f32.mrf.mxu0 }
  0xcf   :  { %v127_v26 = vmax.f32 %v118_v25, 0.0  ;;  %577 = vmatpush3.msk.msra.mxu0 %vm133_vm3, %v128_v24 }
  0xd0   :  { %578 = vmatprep.subr.mxu0 %v605_v7 }
  0xd1   :  { %579 = vmatpush3.msra.mxu0 %v127_v26 }
  0xd2   :  { %581 = vmatmul.mubr.msk.f32.vlgmr.msra.gmra.mxu0 %vm129_vm4, %v19_v27  ;;  %583 = vmatprep.subr.msk.mxu0 %vm48_vm0, %v534_v28 }
  0xd3   :  { %584 = vmatpush3.msk.msra.mxu0 %vm48_vm0, %v534_v28  ;;  %593 = vmatprep.mubr.msk.f32.mxu0 %vm41_vm1, %v642_v2 }
  0xd4   :  { %585 = vmatprep.subr.mxu0 %v533_v29 }
  0xd5   :  { %586 = vmatpush3.msra.mxu0 %v533_v29 }
  0xd6   :  { %587 = vmatprep.subr.mxu0 %v532_v30 }
  0xd7   :  { %588 = vmatpush3.msra.mxu0 %v532_v30 }
  0xd8   :  { %589 = vmatprep.subr.mxu0 %v531_v31 }
  0xd9   :  { %590 = vmatpush3.msra.mxu0 %v531_v31 }
  0xda   :  { %591 = vmatprep.subr.mxu0 %v530_v32 }
  0xdb   :  { %592 = vmatpush3.msra.mxu0 %v530_v32 }
  0xdc   :  { %594 = vmatmul.mubr.msk.f32.vlgmr.msra.gmra.mxu0 %vm41_vm1, %v659_v6  ;;  %596 = vmatprep.subr.mxu0 %v605_v7 }
  0xdd   :  { %600 = vmatprep.mubr.msk.f32.mxu0 %vm606_vm2, %v605_v7 }
 0x192   :  { %v203_v34 = vpop.f32.mrf.mxu0 }
 0x193   :  { %529 = vmatmul.mubr.msk.f32.vlgmr.msra.gmra.mxu1 %vm207_vm5, %v203_v34 }
 0x194   :  { %v582_v35 = vpop.f32.mrf.mxu0  ;;  %463 = vmatpush1.msra.mxu1 %v673_v9  ;;  %510 = vmatprep.mubr.f32.mxu1 %v605_v7 }
 0x195   :  { %464 = vmatprep.subr.mxu1 %v678_v10 }
 0x196   :  { %465 = vmatpush1.msra.mxu1 %v683_v11 }
 0x197   :  { %466 = vmatprep.subr.mxu1 %v689_v12 }
 0x198   :  { %467 = vmatpush1.msra.mxu1 %v695_v13 }
 0x199   :  { %468 = vmatprep.subr.mxu1 %v701_v14 }
 0x19a   :  { %469 = vmatpush1.msra.mxu1 %v28_v15 }
 0x19b   :  { %470 = vmatprep.subr.mxu1 %v27_v16 }
 0x19c   :  { %v595_v36 = vpop.f32.mrf.mxu0  ;;  %471 = vmatpush1.msra.mxu1 %v26_v17 }
 0x19d   :  { %v369_v37 = vmax.f32 %v595_v36, 0.0  ;;  %472 = vmatprep.subr.mxu1 %v25_v18 }
 0x19e   :  { %v359_v38 = vpop.f32.mrf.mxu0  ;;  %473 = vmatpush1.msra.mxu1 %v24_v19 }
 0x19f   :  { %v368_v39 = vmax.f32 %v359_v38, 0.0  ;;  %597 = vmatpush3.msk.msra.mxu0 %vm133_vm3, %v369_v37  ;;  %474 = vmatprep.subr.mxu1 %v724_v20 }
 0x1a0   :  { %598 = vmatprep.subr.mxu0 %v605_v7  ;;  %475 = vmatpush1.msra.mxu1 %v22_v21 }
 0x1a1   :  { %599 = vmatpush3.msra.mxu0 %v368_v39  ;;  %476 = vmatprep.subr.mxu1 %v21_v22 }
 0x1a2   :  { %601 = vmatmul.mubr.msk.f32.vlgmr.msra.gmra.mxu0 %vm129_vm4, %v19_v27  ;;  %477 = vmatpush1.msra.mxu1 %v20_v33 }
 0x253   :  { %v277_v40 = vpop.f32.mrf.mxu1 }
 0x254   :  { %282 = vst [vmem:[%s795_s4] sm:$0x3f] %v277_v40 }
 0x255   :  { %v279_v41 = vpop.f32.mrf.mxu1 }
 0x256   :  { %283 = vst [vmem:[%s795_s4 + $0x8] sm:$0x3f] %v279_v41 }
 0x262   :  { %v439_v42 = vpop.f32.mrf.mxu0 }
 0x263   :  { %540 = vmatmul.mubr.msk.f32.vlgmr.msra.gmra.mxu1 %vm207_vm5, %v439_v42 }
 0x264   :  { %v602_v43 = vpop.f32.mrf.mxu0 }
 0x323   :  { %v512_v44 = vpop.f32.mrf.mxu1 }
 0x324   :  { %541 = vst [vmem:[%s795_s4 + $0x10] sm:$0x3f] %v512_v44 }
 0x325   :  { %v514_v45 = vpop.f32.mrf.mxu1 }
 0x326   :  { %542 = vst [vmem:[%s795_s4 + $0x18] sm:$0x3f] %v514_v45 }

</bundles_post_ra>
